<compile_context>
chip_gen: v7x
topology: tpu7x:2x2x1
jax: 0.10.0
libtpu: 0.0.40
codegen_flags: <defaults>
</compile_context>

<pallas_src>
import functools

import jax
import jax.numpy as jnp
from jax.experimental import pallas as pl
from jax.experimental.pallas import tpu as pltpu


def _se_kernel(x_ref, w1_ref, w2_ref, o_ref, *, inv_hw):
    # x_ref/o_ref: (Bt, C, HWp)  -- HWp is lane-padded (zeros beyond true HW)
    # w1_ref: (C, Cr)   fc1 weight, transposed vs. torch layout
    # w2_ref: (Cr, C)   fc2 weight, transposed vs. torch layout
    x = x_ref[...]                                            # native dtype

    # Squeeze: global average pool.  Sum accumulates in f32; divide by the
    # true spatial size (zero padding keeps the sum correct).
    pooled = jnp.sum(x.astype(jnp.float32), axis=-1) * inv_hw  # (Bt, C) f32

    # Excitation: fc1 -> ReLU -> fc2 -> sigmoid.  Matmuls in the weights'
    # native dtype with f32 accumulation on the MXU.
    h = jnp.dot(pooled.astype(w1_ref.dtype), w1_ref[...],
                preferred_element_type=jnp.float32)            # (Bt, Cr)
    h = jnp.maximum(h, 0.0)
    s = jnp.dot(h.astype(w2_ref.dtype), w2_ref[...],
                preferred_element_type=jnp.float32)            # (Bt, C)
    s = jax.nn.sigmoid(s)

    # Scale: per-channel gate, broadcast over spatial, in native dtype.
    o_ref[...] = x * s.astype(x.dtype)[:, :, None]


def _round_up(n, m):
    return ((n + m - 1) // m) * m


@jax.jit
def se_block(x, w1_t, w2_t):
    """x: (B, C, H, W) NCHW.  w1_t: (C, C//r).  w2_t: (C//r, C)."""
    B, C, H, W = x.shape
    HW = H * W
    Cr = w1_t.shape[1]

    # Lane-dense layout: pad the spatial axis to a multiple of 128.
    LANE = 128
    HWp = max(LANE, _round_up(HW, LANE))
    x3 = x.reshape(B, C, HW)
    if HWp != HW:
        x3 = jnp.pad(x3, ((0, 0), (0, 0), (0, HWp - HW)))

    # Batch tile: as many elements per step as a conservative VMEM budget
    # allows (in + out, double-buffered => 4x block), staying well inside the
    # 32 MiB default scoped VMEM (and v7x's 64 MiB physical VMEM).  Keep at
    # least 2 grid steps when B >= 2 so both v7x TensorCores are used.
    itemsize = jnp.dtype(x.dtype).itemsize
    bytes_per_elem = C * HWp * itemsize
    vmem_budget = 20 * 1024 * 1024
    bt_cap = max(1, vmem_budget // (4 * bytes_per_elem))
    Bt = int(min(B, bt_cap))
    if B >= 2:
        Bt = int(min(Bt, pl.cdiv(B, 2)))
    Bp = pl.cdiv(B, Bt) * Bt
    if Bp != B:
        x3 = jnp.pad(x3, ((0, Bp - B), (0, 0), (0, 0)))
    grid = (Bp // Bt,)

    kernel = functools.partial(_se_kernel, inv_hw=1.0 / HW)

    out3 = pl.pallas_call(
        kernel,
        out_shape=jax.ShapeDtypeStruct((Bp, C, HWp), x.dtype),
        grid_spec=pltpu.PrefetchScalarGridSpec(
            num_scalar_prefetch=0,
            grid=grid,
            in_specs=[
                pl.BlockSpec((Bt, C, HWp), lambda b: (b, 0, 0)),
                pl.BlockSpec((C, Cr), lambda b: (0, 0)),
                pl.BlockSpec((Cr, C), lambda b: (0, 0)),
            ],
            out_specs=pl.BlockSpec((Bt, C, HWp), lambda b: (b, 0, 0)),
        ),
        input_output_aliases={0: 0},  # rescale is elementwise on x
        compiler_params=pltpu.CompilerParams(
            dimension_semantics=("parallel",)),
    )(x3, w1_t, w2_t)

    return out3[:B, :, :HW].reshape(B, C, H, W)


def _reference(x, w1_t, w2_t):
    # Pure-JAX reference mirroring the PyTorch forward.
    y = jnp.mean(x, axis=(2, 3))                    # (B, C)
    y = jnp.maximum(y @ w1_t, 0.0)                  # (B, C//r)
    y = jax.nn.sigmoid(y @ w2_t)                    # (B, C)
    return x * y[:, :, None, None]


if __name__ == "__main__":
    # Shapes: channels=32 with reduction=16 -> hidden=2.
    B, C, H, W = 2, 32, 8, 8
    reduction = 16
    Cr = C // reduction

    key = jax.random.PRNGKey(0)
    kx, k1, k2 = jax.random.split(key, 3)

    x = jax.random.normal(kx, (B, C, H, W), dtype=jnp.float32)
    # torch fc1.weight: (Cr, C), fc2.weight: (C, Cr); store transposed.
    w1_t = jax.random.normal(k1, (C, Cr), dtype=jnp.float32) * 0.1
    w2_t = jax.random.normal(k2, (Cr, C), dtype=jnp.float32) * 0.1

    out = se_block(x, w1_t, w2_t)
    jax.block_until_ready(out)

    ref = _reference(x, w1_t, w2_t)
    assert out.shape == (B, C, H, W)
    assert jnp.allclose(out, ref, atol=1e-5, rtol=1e-5), "mismatch vs reference"

    print("KERNEL_OK")
</pallas_src>

<mosaic_0001>
module attributes {stable_mosaic.version = 11 : i64} {
  func.func @_se_kernel(%arg0: i32, %arg1: memref<1x32x128xf32, #tpu.memory_space<vmem>>, %arg2: memref<32x2xf32, #tpu.memory_space<vmem>>, %arg3: memref<2x32xf32, #tpu.memory_space<vmem>>, %arg4: memref<1x32x128xf32, #tpu.memory_space<vmem>>) attributes {dimension_semantics = [#tpu.dimension_semantics<parallel>], iteration_bounds = array<i64: 2>, scalar_prefetch = 0 : i64, scratch_operands = 0 : i64, tpu.core_type = #tpu.core_type<tc>, window_params = [{transform_indices = @transform_0, window_bounds = array<i64: 1, 32, 128>}, {pipeline_mode = #tpu.pipeline_mode<synchronous>, transform_indices = @transform_1, window_bounds = array<i64: 32, 2>}, {pipeline_mode = #tpu.pipeline_mode<synchronous>, transform_indices = @transform_2, window_bounds = array<i64: 2, 32>}, {transform_indices = @transform_3, window_bounds = array<i64: 1, 32, 128>}]} {
    %c0 = arith.constant 0 : index
    %c0_0 = arith.constant 0 : index
    %c0_1 = arith.constant 0 : index
    %0 = vector.load %arg1[%c0, %c0_0, %c0_1] : memref<1x32x128xf32, #tpu.memory_space<vmem>>, vector<1x32x128xf32>
    %cst = arith.constant dense<0.000000e+00> : vector<1x32xf32>
    %1 = vector.multi_reduction <add>, %0, %cst [2] : vector<1x32x128xf32> to vector<1x32xf32>
    %cst_2 = arith.constant 1.562500e-02 : f32
    %2 = vector.broadcast %cst_2 : f32 to vector<1x32xf32>
    %3 = arith.mulf %1, %2 : vector<1x32xf32>
    %c0_3 = arith.constant 0 : index
    %c0_4 = arith.constant 0 : index
    %4 = vector.load %arg2[%c0_3, %c0_4] : memref<32x2xf32, #tpu.memory_space<vmem>>, vector<32x2xf32>
    %cst_5 = arith.constant dense<0.000000e+00> : vector<1x2xf32>
    %5 = tpu.matmul %3, %4, %cst_5 {dimension_numbers = #tpu.dot_dimension_numbers<[1], [0], [0], [1], [0, 0, 1, 1], [], []>} : vector<1x32xf32>, vector<32x2xf32>, vector<1x2xf32> -> vector<1x2xf32>
    %cst_6 = arith.constant 0.000000e+00 : f32
    %6 = vector.broadcast %cst_6 : f32 to vector<1x2xf32>
    %7 = arith.maximumf %5, %6 : vector<1x2xf32>
    %c0_7 = arith.constant 0 : index
    %c0_8 = arith.constant 0 : index
    %8 = vector.load %arg3[%c0_7, %c0_8] : memref<2x32xf32, #tpu.memory_space<vmem>>, vector<2x32xf32>
    %cst_9 = arith.constant dense<0.000000e+00> : vector<1x32xf32>
    %9 = tpu.matmul %7, %8, %cst_9 {dimension_numbers = #tpu.dot_dimension_numbers<[1], [0], [0], [1], [0, 0, 1, 1], [], []>} : vector<1x2xf32>, vector<2x32xf32>, vector<1x32xf32> -> vector<1x32xf32>
    %10 = arith.negf %9 : vector<1x32xf32>
    %11 = math.exp %10 : vector<1x32xf32>
    %cst_10 = arith.constant 1.000000e+00 : f32
    %12 = vector.broadcast %cst_10 : f32 to vector<1x32xf32>
    %13 = arith.addf %12, %11 : vector<1x32xf32>
    %14 = arith.divf %12, %13 : vector<1x32xf32>
    %15 = vector.shape_cast %14 : vector<1x32xf32> to vector<1x32x1xf32>
    %16 = vector.broadcast %15 : vector<1x32x1xf32> to vector<1x32x128xf32>
    %17 = arith.mulf %0, %16 : vector<1x32x128xf32>
    %c0_11 = arith.constant 0 : index
    %c0_12 = arith.constant 0 : index
    %c0_13 = arith.constant 0 : index
    %18 = vector.load %arg4[%c0_11, %c0_12, %c0_13] : memref<1x32x128xf32, #tpu.memory_space<vmem>>, vector<1x32x128xf32>
    tpu.vector_store %arg4[%c0_11, %c0_12, %c0_13], %17 {strides = array<i32>} : memref<1x32x128xf32, #tpu.memory_space<vmem>>, vector<1x32x128xf32>,
    return
  }
  func.func @transform_0(%arg0: i32) -> (i32, i32, i32) {
    %c0_i32 = arith.constant 0 : i32
    %c0_i32_0 = arith.constant 0 : i32
    %c0_i32_1 = arith.constant 0 : i32
    return %arg0, %c0_i32, %c0_i32_0 : i32, i32, i32
  }
  func.func @transform_1(%arg0: i32) -> (i32, i32) {
    %c0_i32 = arith.constant 0 : i32
    %c0_i32_0 = arith.constant 0 : i32
    %c0_i32_1 = arith.constant 0 : i32
    return %c0_i32, %c0_i32_0 : i32, i32
  }
  func.func @transform_2(%arg0: i32) -> (i32, i32) {
    %c0_i32 = arith.constant 0 : i32
    %c0_i32_0 = arith.constant 0 : i32
    %c0_i32_1 = arith.constant 0 : i32
    return %c0_i32, %c0_i32_0 : i32, i32
  }
  func.func @transform_3(%arg0: i32) -> (i32, i32, i32) {
    %c0_i32 = arith.constant 0 : i32
    %c0_i32_0 = arith.constant 0 : i32
    %c0_i32_1 = arith.constant 0 : i32
    return %arg0, %c0_i32, %c0_i32_0 : i32, i32, i32
  }
}

</mosaic_0001>

<bundles_post_ra>
// kernel: se_block.1
= control target key start
LH: loop header
LB: loop body
LE: loop exit
PB: predicated region body
PF: predicated region fallthrough
CT: control target
= control target key end

     0   :  { %s555_s12 = smov 0   ;;  %s610_s0 = inlined_call_operand.vmem [shape: f32[2,32,128], index: 0, kind: input, shape index: {}, may-alias: {0,3}]   ;;  %s611_s1 = inlined_call_operand.vmem [shape: f32[32,2], index: 1, kind: input, shape index: {}]   ;;  %s612_s2 = inlined_call_operand.vmem [shape: f32[2,32], index: 2, kind: input, shape index: {}]   ;;  %s613_s3 = inlined_call_operand.vmem [shape: f32[2,32,128], index: 3, kind: output, shape index: {}, may-alias: {0,3}]  }
   0x1 LB: > { %s463_s13 = sadd.s32 4294967295, %s530_s12   ;;  %p467_p0 = scmp.ge.s32.totalorder %s530_s12, 1  ;;  %s530_s12 = sphi %s555_s12, %s13_s12  }
   0x2   : > { %p137_p1 = scmp.lt.s32.totalorder %s530_s12, 3 }
   0x4   : > { %p138_p2 = pnand %p467_p0, %p137_p1 }
   0x5   : > { %p161_p3 = scmp.lt.s32.totalorder (!%p138_p2), %s463_s13, 1  ;;  %v187_v4 = vld [vmem:[%s611_s1] sm:$0xff] (!%p138_p2)  ;;  %v188_v5 = vld [vmem:[%s611_s1 + $0x8] sm:$0xff] (!%p138_p2)  ;;  %v532_v6 = vmov (!%p138_p2), 0.0|0.0   ;;  %v189_v8 = vld [vmem:[%s611_s1 + $0x10] sm:$0xff] (!%p138_p2)  ;;  %vm533_vm0 = vmmov (!%p138_p2), 0   ;;  %v195_v12 = vlaneseq (!%p138_p2) }
   0x6   : > { %141 = sbr.rel (%p138_p2) target bundleno = 750 (0x2ee), region = 32  ;;  %503 = vmatprep.subr.bf16.mxu0 (!%p138_p2), %v532_v6  ;;  %v504_v7 = vpack.c.bf16 (!%p138_p2), %v188_v5, %v187_v4  ;;  %v190_v9 = vld [vmem:[%s611_s1 + $0x18] sm:$0xff] (!%p138_p2)  ;;  %v534_v11 = vmov (!%p138_p2), 0.0   ;;  %vm206_vm1 = vcmask (!%p138_p2), 130112   ;;  %vm213_vm2 = vcmask (!%p138_p2), 195712  }
   0x7   : > { %v507_v10 = vpack.c.bf16 (!%p138_p2), %v190_v9, %v189_v8  ;;  %495 = vmatprep.mubr.msk.f32.mxu0 (!%p138_p2), %vm533_vm0, %v534_v11  ;;  %498 = vmatprep.subr.mxu1 (!%p138_p2), %v534_v11  ;;  %v196_v13 = vand.u32 (!%p138_p2), 127, %v195_v12  ;;  %v198_v14 = vshrl.u32 (!%p138_p2), %v195_v12, 7  ;;  %vm220_vm3 = vcmask (!%p138_p2), 261312   ;;  %v296_v37 = vld [vmem:[%s612_s2] sm:$0x3] (!%p138_p2) }
   0x8   : > { %505 = vmatpush3.bf16.msra.mxu0 (!%p138_p2), %v504_v7  ;;  %500 = vmatprep.mubr.msk.f32.mxu1 (!%p138_p2), %vm533_vm0, %v534_v11  ;;  %vm222_vm4 = vcmask (!%p138_p2), 261120   ;;  %vm301_vm5 = vcmask (!%p138_p2), 1041408   ;;  %vm297_vm6 = vcmask (!%p138_p2), 15360  }
   0x9   : > { %506 = vmatprep.subr.bf16.mxu0 (!%p138_p2), %v532_v6  ;;  %v201_v15 = vadd.s32 (!%p138_p2), 4294967288, %v196_v13  ;;  %v215_v16 = vadd.s32 (!%p138_p2), 4294967272, %v196_v13  ;;  %v208_v18 = vadd.s32 (!%p138_p2), 4294967280, %v196_v13  ;;  %v199_v20 = vsub.s32 (!%p138_p2), %v196_v13, %v198_v14  ;;  %499 = vmatpush3.msk.msra.mxu1 (!%p138_p2), %vm301_vm5, %v296_v37 }
   0xa   : > { %v383_v46 = vsub.s32 (!%p138_p2), 0, %v198_v14 }
   0xb   : > { %v204_v22 = vsub.s32 (!%p138_p2), %v201_v15, %v198_v14  ;;  %v218_v23 = vsub.s32 (!%p138_p2), %v215_v16, %v198_v14  ;;  %v211_v24 = vsub.s32 (!%p138_p2), %v208_v18, %v198_v14 }
   0xc   : > { %508 = vmatpush3.bf16.msra.mxu0 (!%p138_p2), %v507_v10 }
   0xd   : > { %s615_s13 = smov (!%p161_p3, %s463_s13), 1 }
   0xe   : > { %s478_s14 = sshll.u32 %s615_s13, 5 }
   0xf   : > { %s165_s17 = scalar_lea.vmem %s610_s0, %s478_s14  ;;  %s170_s30 = scalar_lea.vmem %s613_s3, %s478_s14 }
  0x10   : > { %v571_v0 = vld [vmem:[%s165_s17] sm:$0xff]  ;;  %v573_v1 = vld [vmem:[%s165_s17 + $0x10] sm:$0xff]  ;;  %v577_v2 = vld [vmem:[%s165_s17 + $0x8] sm:$0xff] }
  0x11   : > { %175 = vadd.xlane.f32.xlu0 %v571_v0  ;;  %179 = vadd.xlane.f32.xlu1 %v573_v1  ;;  %v579_v3 = vld [vmem:[%s165_s17 + $0x18] sm:$0xff] }
  0x15   : > { %177 = vadd.xlane.f32.xlu0 %v577_v2  ;;  %181 = vadd.xlane.f32.xlu1 %v579_v3 }
  0x9e   : > { %v176_v17 = vpop.xlane.xlu0 %175  ;;  %v180_v19 = vpop.xlane.xlu1 %179 }
  0x9f   : > { %v183_v21 = vmul.f32 0.015625, %v176_v17  ;;  %v185_v25 = vmul.f32 0.015625, %v180_v19 }
  0xa1   : > { %v200_v30 = vrot.slane %v183_v21, %v199_v20  ;;  %v212_v33 = vrot.slane %v185_v25, %v211_v24 }
  0xa2   : > { %v178_v26 = vpop.xlane.xlu0 %177  ;;  %v182_v27 = vpop.xlane.xlu1 %181 }
  0xa3   : > { %v184_v28 = vmul.f32 0.015625, %v178_v26  ;;  %v186_v29 = vmul.f32 0.015625, %v182_v27 }
  0xa5   : > { %v205_v31 = vrot.slane %v184_v28, %v204_v22  ;;  %v219_v32 = vrot.slane %v186_v29, %v218_v23 }
  0xa7   : > { %v207_v34 = vsel %vm206_vm1, %v205_v31, %v200_v30 }
  0xa8   : > { %v214_v35 = vsel %vm213_vm2, %v212_v33, %v207_v34 }
  0xa9   : > { %v221_v36 = vsel %vm220_vm3, %v219_v32, %v214_v35 }
  0xaa   : > { %496 = vmatmul.mubr.msk.f32.vlgmr.msra.gmra.mrb[0].mxu0 %vm222_vm4, %v221_v36 }
 0x17d   : > { %v291_v38 = vpop.f32.mrb[0].mxu0 }
 0x17e   : > { %v295_v39 = vmax.f32 %v291_v38, 0.0  ;;  %v497_v40 = vpop.f32.mrb[1].mxu0 }
 0x180   : > { %501 = vmatmul.mubr.msk.f32.vlgmr.msra.gmra.mrb[0].mxu1 %vm297_vm6, %v295_v39 }
 0x253   : > { %v371_v41 = vpop.f32.mrb[0].mxu1 }
 0x254   : > { %v475_v42 = vmul.f32 -1.442695, %v371_v41  ;;  %v502_v43 = vpop.f32.mrb[1].mxu1 }
 0x256   : > { %520 = vpow2.f32 %v475_v42 }
 0x260   : > { %v521_v44 = vpop.eup %520 }
 0x261   : > { %v378_v45 = vadd.f32 1.0, %v521_v44 }
 0x263   : > { %522 = vrcp.f32 %v378_v45 }
 0x26d   : > { %v523_v47 = vpop.eup %522 }
 0x26e   : > { %v384_v48 = vrot.slane %v523_v47, %v383_v46 }
 0x270   : > { %390 = vbcast.lane.b32.xlu1 %v384_v48, 264  ;;  %386 = vbcast.lane.b32.xlu0 %v384_v48, 256 }
 0x274   : > { %394 = vbcast.lane.b32.xlu1 %v384_v48, 272 }
 0x278   : > { %398 = vbcast.lane.b32.xlu1 %v384_v48, 280 }
 0x2e2   : > { %v391_v49 = vpop.permute.xlu1 %390  ;;  %v387_v50 = vpop.permute.xlu0 %386 }
 0x2e3   : > { %v401_v51 = vmul.f32 %v391_v49, %v577_v2  ;;  %v400_v52 = vmul.f32 %v387_v50, %v571_v0 }
 0x2e5   : > { %405 = vst [vmem:[%s170_s30 + $0x8] sm:$0xff] %v401_v51  ;;  %404 = vst [vmem:[%s170_s30] sm:$0xff] %v400_v52 }
 0x2e6   : > { %v395_v53 = vpop.permute.xlu1 %394 }
 0x2e7   : > { %v402_v54 = vmul.f32 %v395_v53, %v573_v1 }
 0x2e9   : > { %406 = vst [vmem:[%s170_s30 + $0x10] sm:$0xff] %v402_v54 }
 0x2ea   : > { %v399_v55 = vpop.permute.xlu1 %398 }
 0x2eb   : > { %v403_v56 = vmul.f32 %v399_v55, %v579_v3 }
 0x2ed   : > { %407 = vst [vmem:[%s170_s30 + $0x18] sm:$0xff] %v403_v56 }
 0x2ee PF: > { %s13_s12 = sadd.s32 1, %s530_s12  }
 0x2ef   : > { %p10_p4 = scmp.ge.s32.totalorder %s13_s12, 4  }
 0x2f1   :  { %12 = sbr.rel (!%p10_p4) target bundleno = 1 (0x1), region = 62 }

</bundles_post_ra>
